<compile_context>
chip_gen: v5e
topology: v5e:2x2
jax: 0.10.0
libtpu: 0.0.40
codegen_flags: <defaults>
</compile_context>

<pallas_src>
import jax
import jax.numpy as jnp
from jax.experimental import pallas as pl
from jax.experimental.pallas import tpu as pltpu


def _ceak_kernel(ids_ref, w_ref, row_ref, w1_ref, b1_ref, w2r_ref, b2_ref,
                 out_ref, x_acc):
    """Grid axis 0 = flattened token position t in [0, R*S)."""
    del ids_ref  # only consumed by the index_maps (data-dependent gather)
    t = pl.program_id(0)

    @pl.when(t == 0)
    def _():
        x_acc[...] = jnp.zeros_like(x_acc)

    # Fused gather + mean-over-seq + ratio combine, accumulated in f32 on VPU:
    #   x += (ratio[r] / S) * emb_table[ids[t]]
    x_acc[...] += w_ref[t] * row_ref[0].astype(jnp.float32)          # [1, E]

    @pl.when(t == pl.num_programs(0) - 1)
    def _():
        x = x_acc[...]                                               # [1, E] f32
        # fc1 (pooling already folded into W1_eff) + ReLU; f32 accumulation.
        h = jnp.dot(x, w1_ref[...], preferred_element_type=jnp.float32)
        h = jnp.maximum(h + b1_ref[...].astype(jnp.float32), 0.0)    # [1, H']
        # fc2 as VPU multiply + lane reduction (w2 passed lane-dense [1, H']).
        z = jnp.sum(h * w2r_ref[...].astype(jnp.float32), axis=-1,
                    keepdims=True)
        z = z + b2_ref[0, 0]                                         # [1, 1]
        # Softplus (PyTorch default: beta=1, threshold=20).
        out_ref[...] = jnp.where(z > 20.0, z,
                                 jnp.log1p(jnp.exp(jnp.minimum(z, 20.0))))


def ceak_llama_forward(input_ids, emb_table, w1, b1, w2, b2, pooling=None):
    """input_ids: [R, S+1]; col 0 = ratio, cols 1: = token ids (as floats)."""
    R = input_ids.shape[0]
    S = input_ids.shape[1] - 1
    V, E = emb_table.shape

    ratio = input_ids[:, 0].astype(jnp.float32)                      # [R]
    # Token ids travel through the float input row; exact for ids < 2^24.
    ids = input_ids[:, 1:].astype(jnp.int32)                         # [R, S]
    # TODO(synk): PyTorch nn.Embedding errors on out-of-range ids; we clip so
    # the data-dependent DMA index stays in bounds.
    ids_flat = jnp.clip(ids.reshape(-1), 0, V - 1)                   # [R*S] i32

    # Per-token-position weight = ratio[r] / S (fuses the sequence mean).
    w_flat = jnp.repeat(ratio / S, S)                                # [R*S] f32

    # Fold avg_pool1d(kernel=stride=p) into W1 (exact: pooling is linear).
    if pooling and pooling > 1:
        assert E % pooling == 0, "embedding_dim must be divisible by pooling"
        w1_eff = jnp.repeat(w1, pooling, axis=0) / float(pooling)    # [E, H']
    else:
        w1_eff = w1                                                  # [E, H']
    H = w1_eff.shape[1]

    # View table as [V, 1, E] so the gathered block (1, 1, E) keeps its last
    # two dims equal to the full array dims (layout-friendly row DMA).
    table3d = emb_table.reshape(V, 1, E)
    b1_2d = jnp.asarray(b1, w1_eff.dtype).reshape(1, H)
    w2_row = jnp.asarray(w2).reshape(1, H)                           # lane-dense
    b2_2d = jnp.asarray(b2, jnp.float32).reshape(1, 1)               # SMEM scalar

    # VMEM budget from actual footprints (+4x headroom for double-buffering /
    # internal scratch); floor at 16 MiB, well under v7x's 64 MiB physical.
    row_bytes = E * jnp.dtype(emb_table.dtype).itemsize
    footprint = (2 * row_bytes
                 + E * H * jnp.dtype(w1_eff.dtype).itemsize
                 + 2 * H * jnp.dtype(w2_row.dtype).itemsize
                 + E * 4 + 4)
    vmem_limit = int(min(96 << 20, max(16 << 20, 4 * footprint)))

    grid_spec = pltpu.PrefetchScalarGridSpec(
        num_scalar_prefetch=1,               # ids -> SMEM, feeds the index_maps
        grid=(R * S,),                        # one gathered embedding row / step
        in_specs=[
            pl.BlockSpec(memory_space=pltpu.MemorySpace.SMEM),       # w_flat
            pl.BlockSpec((1, 1, E), lambda t, ids: (ids[t], 0, 0)),  # emb row
            pl.BlockSpec((E, H), lambda t, ids: (0, 0)),             # W1_eff
            pl.BlockSpec((1, H), lambda t, ids: (0, 0)),             # b1
            pl.BlockSpec((1, H), lambda t, ids: (0, 0)),             # w2 row
            pl.BlockSpec(memory_space=pltpu.MemorySpace.SMEM),       # b2
        ],
        out_specs=pl.BlockSpec((1, 1), lambda t, ids: (0, 0)),
        scratch_shapes=[pltpu.VMEM((1, E), jnp.float32)],            # x accum
    )

    return pl.pallas_call(
        _ceak_kernel,
        out_shape=jax.ShapeDtypeStruct((1, 1), jnp.float32),
        grid_spec=grid_spec,
        compiler_params=pltpu.CompilerParams(
            dimension_semantics=("arbitrary",),   # sequential reduction axis
            vmem_limit_bytes=vmem_limit),
    )(ids_flat, w_flat, table3d, w1_eff, b1_2d, w2_row, b2_2d)


def _reference(input_ids, emb_table, w1, b1, w2, b2, pooling=None):
    """Pure-JAX reference mirroring the PyTorch forward."""
    ratio = input_ids[:, 0].astype(jnp.float32)[None, :]
    ids = input_ids[:, 1:].astype(jnp.int32)
    mean_emb = jnp.take(emb_table.astype(jnp.float32), ids, axis=0).mean(axis=1)
    x = ratio @ mean_emb                                             # [1, E]
    if pooling:
        x = x.reshape(1, x.shape[1] // pooling, pooling).mean(-1)    # avg_pool1d
    h = jnp.maximum(x @ w1 + b1, 0.0)
    z = h @ w2 + b2
    return jnp.where(z > 20.0, z, jnp.log1p(jnp.exp(jnp.minimum(z, 20.0))))


if __name__ == "__main__":
    # Small, module-consistent shapes: 7 rows (fixed by EmbeddingNetwork),
    # seq_len=8, vocab=64, embedding_dim=32, hidden_dim=32.
    vocab_size, embedding_dim, hidden_dim = 64, 32, 32
    num_rows, seq_len = 7, 8

    key = jax.random.PRNGKey(0)
    keys = jax.random.split(key, 8)

    emb_table = jax.random.normal(keys[0], (vocab_size, embedding_dim),
                                  jnp.float32)
    ids = jax.random.randint(keys[1], (num_rows, seq_len), 0, vocab_size)
    ratio = jax.random.uniform(keys[2], (num_rows,), jnp.float32)
    # Emulate the PyTorch [7, max_seq_len+1] input: first column is the ratio.
    input_ids = jnp.concatenate([ratio[:, None], ids.astype(jnp.float32)],
                                axis=1)

    ok = True
    for pooling in (None, 2):
        # MLP dims follow the module: pooling divides embedding_dim/hidden_dim.
        e_in = embedding_dim // pooling if pooling else embedding_dim
        h_in = hidden_dim // pooling if pooling else hidden_dim
        w1 = 0.1 * jax.random.normal(keys[3], (e_in, h_in), jnp.float32)
        b1 = 0.1 * jax.random.normal(keys[4], (1, h_in), jnp.float32)
        w2 = 0.1 * jax.random.normal(keys[5], (h_in, 1), jnp.float32)
        b2 = 0.1 * jax.random.normal(keys[6], (1, 1), jnp.float32)

        out = ceak_llama_forward(input_ids, emb_table, w1, b1, w2, b2,
                                 pooling=pooling)
        out = jax.block_until_ready(out)
        ref = _reference(input_ids, emb_table, w1, b1, w2, b2, pooling=pooling)

        assert out.shape == (1, 1), out.shape
        if not jnp.allclose(out, ref, atol=2e-5, rtol=1e-4):
            ok = False
            print(f"MISMATCH pooling={pooling}: kernel={out} ref={ref}")

    if ok:
        print("KERNEL_OK")
</pallas_src>

<mosaic_0001>
module attributes {stable_mosaic.version = 11 : i64} {
  func.func @_ceak_kernel(%arg0: i32, %arg1: memref<56xi32, #tpu.memory_space<smem>>, %arg2: memref<56xf32, #tpu.memory_space<smem>>, %arg3: memref<1x1x32xf32, #tpu.memory_space<vmem>>, %arg4: memref<32x32xf32, #tpu.memory_space<vmem>>, %arg5: memref<1x32xf32, #tpu.memory_space<vmem>>, %arg6: memref<1x32xf32, #tpu.memory_space<vmem>>, %arg7: memref<1x1xf32, #tpu.memory_space<smem>>, %arg8: memref<1x1xf32, #tpu.memory_space<vmem>>, %arg9: memref<1x32xf32, #tpu.memory_space<vmem>>) attributes {dimension_semantics = [#tpu.dimension_semantics<arbitrary>], iteration_bounds = array<i64: 56>, scalar_prefetch = 1 : i64, scratch_operands = 1 : i64, tpu.core_type = #tpu.core_type<tc>, window_params = [{transform_indices = @transform_0, window_bounds = array<i64: 56>}, {transform_indices = @transform_1, window_bounds = array<i64: 1, 1, 32>}, {pipeline_mode = #tpu.pipeline_mode<synchronous>, transform_indices = @transform_2, window_bounds = array<i64: 32, 32>}, {pipeline_mode = #tpu.pipeline_mode<synchronous>, transform_indices = @transform_3, window_bounds = array<i64: 1, 32>}, {pipeline_mode = #tpu.pipeline_mode<synchronous>, transform_indices = @transform_4, window_bounds = array<i64: 1, 32>}, {transform_indices = @transform_5, window_bounds = array<i64: 1, 1>}, {pipeline_mode = #tpu.pipeline_mode<synchronous>, transform_indices = @transform_6, window_bounds = array<i64: 1, 1>}]} {
    %c0_i32 = arith.constant 0 : i32
    %0 = arith.cmpi eq, %arg0, %c0_i32 : i32
    %1 = arith.extui %0 : i1 to i32
    %c0_i32_0 = arith.constant 0 : i32
    %2 = arith.cmpi ne, %1, %c0_i32_0 : i32
    scf.if %2 {
      %cst = arith.constant 0.000000e+00 : f32
      %15 = vector.broadcast %cst : f32 to vector<1x32xf32>
      %c0_8 = arith.constant 0 : index
      %c0_9 = arith.constant 0 : index
      %16 = vector.load %arg9[%c0_8, %c0_9] : memref<1x32xf32, #tpu.memory_space<vmem>>, vector<1x32xf32>
      tpu.vector_store %arg9[%c0_8, %c0_9], %15 {strides = array<i32>} : memref<1x32xf32, #tpu.memory_space<vmem>>, vector<1x32xf32>,
    } else {
    }
    %c0 = arith.constant 0 : index
    %c0_1 = arith.constant 0 : index
    %3 = vector.load %arg9[%c0, %c0_1] : memref<1x32xf32, #tpu.memory_space<vmem>>, vector<1x32xf32>
    %4 = arith.index_cast %arg0 : i32 to index
    %5 = memref.load %arg2[%4] : memref<56xf32, #tpu.memory_space<smem>>
    %c0_2 = arith.constant 0 : index
    %c0_3 = arith.constant 0 : index
    %c0_4 = arith.constant 0 : index
    %6 = vector.load %arg3[%c0_2, %c0_3, %c0_4] : memref<1x1x32xf32, #tpu.memory_space<vmem>>, vector<1x1x32xf32>
    %7 = vector.shape_cast %6 : vector<1x1x32xf32> to vector<1x32xf32>
    %8 = vector.broadcast %5 : f32 to vector<1x32xf32>
    %9 = arith.mulf %8, %7 : vector<1x32xf32>
    %10 = arith.addf %3, %9 : vector<1x32xf32>
    %c0_5 = arith.constant 0 : index
    %c0_6 = arith.constant 0 : index
    %11 = vector.load %arg9[%c0_5, %c0_6] : memref<1x32xf32, #tpu.memory_space<vmem>>, vector<1x32xf32>
    tpu.vector_store %arg9[%c0_5, %c0_6], %10 {strides = array<i32>} : memref<1x32xf32, #tpu.memory_space<vmem>>, vector<1x32xf32>,
    %c55_i32 = arith.constant 55 : i32
    %12 = arith.cmpi eq, %arg0, %c55_i32 : i32
    %13 = arith.extui %12 : i1 to i32
    %c0_i32_7 = arith.constant 0 : i32
    %14 = arith.cmpi ne, %13, %c0_i32_7 : i32
    scf.if %14 {
      %c0_8 = arith.constant 0 : index
      %c0_9 = arith.constant 0 : index
      %15 = vector.load %arg9[%c0_8, %c0_9] : memref<1x32xf32, #tpu.memory_space<vmem>>, vector<1x32xf32>
      %c0_10 = arith.constant 0 : index
      %c0_11 = arith.constant 0 : index
      %16 = vector.load %arg4[%c0_10, %c0_11] : memref<32x32xf32, #tpu.memory_space<vmem>>, vector<32x32xf32>
      %cst = arith.constant dense<0.000000e+00> : vector<1x32xf32>
      %17 = tpu.matmul %15, %16, %cst {dimension_numbers = #tpu.dot_dimension_numbers<[1], [0], [0], [1], [0, 0, 1, 1], [], []>} : vector<1x32xf32>, vector<32x32xf32>, vector<1x32xf32> -> vector<1x32xf32>
      %c0_12 = arith.constant 0 : index
      %c0_13 = arith.constant 0 : index
      %18 = vector.load %arg5[%c0_12, %c0_13] : memref<1x32xf32, #tpu.memory_space<vmem>>, vector<1x32xf32>
      %19 = arith.addf %17, %18 : vector<1x32xf32>
      %cst_14 = arith.constant 0.000000e+00 : f32
      %20 = vector.broadcast %cst_14 : f32 to vector<1x32xf32>
      %21 = arith.maximumf %19, %20 : vector<1x32xf32>
      %c0_15 = arith.constant 0 : index
      %c0_16 = arith.constant 0 : index
      %22 = vector.load %arg6[%c0_15, %c0_16] : memref<1x32xf32, #tpu.memory_space<vmem>>, vector<1x32xf32>
      %23 = arith.mulf %21, %22 : vector<1x32xf32>
      %cst_17 = arith.constant dense<0.000000e+00> : vector<1xf32>
      %24 = vector.multi_reduction <add>, %23, %cst_17 [1] : vector<1x32xf32> to vector<1xf32>
      %25 = vector.shape_cast %24 : vector<1xf32> to vector<1x1xf32>
      %c0_18 = arith.constant 0 : index
      %c0_19 = arith.constant 0 : index
      %26 = memref.load %arg7[%c0_18, %c0_19] : memref<1x1xf32, #tpu.memory_space<smem>>
      %27 = vector.broadcast %26 : f32 to vector<1x1xf32>
      %28 = arith.addf %25, %27 : vector<1x1xf32>
      %cst_20 = arith.constant 2.000000e+01 : f32
      %29 = vector.broadcast %cst_20 : f32 to vector<1x1xf32>
      %30 = arith.cmpf ogt, %28, %29 : vector<1x1xf32>
      %cst_21 = arith.constant 2.000000e+01 : f32
      %31 = vector.broadcast %cst_21 : f32 to vector<1x1xf32>
      %32 = arith.minimumf %28, %31 : vector<1x1xf32>
      %33 = math.exp %32 : vector<1x1xf32>
      %34 = math.log1p %33 : vector<1x1xf32>
      %35 = arith.select %30, %28, %34 : vector<1x1xi1>, vector<1x1xf32>
      %c0_22 = arith.constant 0 : index
      %c0_23 = arith.constant 0 : index
      %36 = vector.load %arg8[%c0_22, %c0_23] : memref<1x1xf32, #tpu.memory_space<vmem>>, vector<1x1xf32>
      tpu.vector_store %arg8[%c0_22, %c0_23], %35 {strides = array<i32>} : memref<1x1xf32, #tpu.memory_space<vmem>>, vector<1x1xf32>,
    } else {
    }
    return
  }
  func.func @transform_0(%arg0: i32, %arg1: memref<56xi32, #tpu.memory_space<smem>>) -> i32 {
    %c0_i32 = arith.constant 0 : i32
    %c0_i32_0 = arith.constant 0 : i32
    return %c0_i32 : i32
  }
  func.func @transform_1(%arg0: i32, %arg1: memref<56xi32, #tpu.memory_space<smem>>) -> (i32, i32, i32) {
    %0 = arith.index_cast %arg0 : i32 to index
    %1 = memref.load %arg1[%0] : memref<56xi32, #tpu.memory_space<smem>>
    %c0_i32 = arith.constant 0 : i32
    %c0_i32_0 = arith.constant 0 : i32
    %c0_i32_1 = arith.constant 0 : i32
    return %1, %c0_i32, %c0_i32_0 : i32, i32, i32
  }
  func.func @transform_2(%arg0: i32, %arg1: memref<56xi32, #tpu.memory_space<smem>>) -> (i32, i32) {
    %c0_i32 = arith.constant 0 : i32
    %c0_i32_0 = arith.constant 0 : i32
    %c0_i32_1 = arith.constant 0 : i32
    return %c0_i32, %c0_i32_0 : i32, i32
  }
  func.func @transform_3(%arg0: i32, %arg1: memref<56xi32, #tpu.memory_space<smem>>) -> (i32, i32) {
    %c0_i32 = arith.constant 0 : i32
    %c0_i32_0 = arith.constant 0 : i32
    %c0_i32_1 = arith.constant 0 : i32
    return %c0_i32, %c0_i32_0 : i32, i32
  }
  func.func @transform_4(%arg0: i32, %arg1: memref<56xi32, #tpu.memory_space<smem>>) -> (i32, i32) {
    %c0_i32 = arith.constant 0 : i32
    %c0_i32_0 = arith.constant 0 : i32
    %c0_i32_1 = arith.constant 0 : i32
    return %c0_i32, %c0_i32_0 : i32, i32
  }
  func.func @transform_5(%arg0: i32, %arg1: memref<56xi32, #tpu.memory_space<smem>>) -> (i32, i32) {
    %c0_i32 = arith.constant 0 : i32
    %c0_i32_0 = arith.constant 0 : i32
    %c0_i32_1 = arith.constant 0 : i32
    return %c0_i32, %c0_i32_0 : i32, i32
  }
  func.func @transform_6(%arg0: i32, %arg1: memref<56xi32, #tpu.memory_space<smem>>) -> (i32, i32) {
    %c0_i32 = arith.constant 0 : i32
    %c0_i32_0 = arith.constant 0 : i32
    %c0_i32_1 = arith.constant 0 : i32
    return %c0_i32, %c0_i32_0 : i32, i32
  }
}

</mosaic_0001>

<bundles_post_ra>
// kernel: tpu_custom_call.1
= control target key start
LH: loop header
LB: loop body
LE: loop exit
PB: predicated region body
PF: predicated region fallthrough
CT: control target
= control target key end

     0   :  { %s511_s29 = smov [#allocation4]   ;;  %s611_s0 = inlined_call_operand.vmem [shape: s32[56], index: 0, kind: input, shape index: {}]   ;;  %s612_s1 = inlined_call_operand.vmem [shape: f32[56], index: 1, kind: input, shape index: {}]   ;;  %s613_s2 = inlined_call_operand.vmem [shape: f32[64,1,32], index: 2, kind: input, shape index: {}]   ;;  %s614_s3 = inlined_call_operand.vmem [shape: f32[32,32], index: 3, kind: input, shape index: {}]   ;;  %s615_s4 = inlined_call_operand.vmem [shape: f32[1,32], index: 4, kind: input, shape index: {}]   ;;  %s616_s5 = inlined_call_operand.vmem [shape: f32[1,32], index: 5, kind: input, shape index: {}]   ;;  %s617_s6 = inlined_call_operand.<no memory space> [shape: f32[1,1], index: 6, kind: input, shape index: {}]   ;;  %s618_s7 = inlined_call_operand.hbm [shape: f32[1,1], index: 7, kind: output, shape index: {}]  }
   0x1   :  { %s13_s26 = sshll.u32 %s611_s0, 4  ;;  %17 = sst [smem:[#allocation5]] %s617_s6  ;;  %s14_s26 = int_to_ptr.vmem [resolvable:$true] %s13_s26 }
   0x2   :  { %16 = dma.vmem_to_smem %s14_s26, 16, %s511_s29, [#allocation3] }
   0x3   :  { %497 = dma.done.wait [#allocation3], 16 }
   0x4   :  { %498 = vsyncadd [#allocation3], 4294967280 }
   0x5   :  { %20 = sfence }
   0x6   :  { %21 = vsyncpa [#allocation8], 0 }
   0x7   :  { %22 = vsyncpa [#allocation7], 0  ;;  %s561_s30 = smov 0  }
   0x8 LB: > { %s567_s0 = sadd.s32 4294967295, %s509_s30   ;;  %p394_p0 = scmp.ge.s32.totalorder %s509_s30, 1  ;;  %s509_s30 = sphi %s561_s30, %s28_s30  }
   0x9   : > { %p187_p1 = scmp.lt.s32.totalorder %s509_s30, 57  ;;  %p395_p2 = scmp.ne.s32.totalorder %s567_s0, 0 }
   0xa   : > { %s199_s9 = sshll.u32 %s612_s1, 4  ;;  %p418_p4 = scmp.eq.s32.totalorder %s567_s0, 0  ;;  %s200_s9 = int_to_ptr.vmem [resolvable:$true] %s199_s9 }
   0xb   : > { %p188_p3 = pnand %p394_p0, %p187_p1  ;;  %s512_s10 = smov [#allocation6]  }
   0xd   : > { %p414_p5 = pneg %p188_p3  ;;  %232 = sbr.rel (%p188_p3) target bundleno = 334 (0x14e), region = 44 }
   0xf   : > { %p415_p6 = pnand %p418_p4, %p414_p5 }
  0x11   : > { %417 = dma.vmem_to_smem (!%p415_p6), %s200_s9, 16, %s512_s10, [#allocation8]  }
  0x12   : > { %500 = dma.done.wait (%p418_p4), [#allocation8], 16  }
  0x13   : > { %502 = vsyncadd (%p418_p4), [#allocation8], 4294967280 }
  0x14   : > { %239 = sfence }
  0x15   : > { %s258_s11 = sld [smem:[#allocation4 + %s567_s0]] }
  0x1a   : > { %266 = sbr.rel (%p395_p2) target bundleno = 33 (0x21), region = 52 }
  0x1b   : > { %p259_p7 = scmp.lt.s32.totalorder %s258_s11, 63 }
  0x1d   : > { %s620_s11 = smov (!%p259_p7, %s258_s11), 63 }
  0x1e   : > { %s261_s14 = scalar_lea.vmem %s613_s2, %s620_s11 }
  0x1f   : > { %vm267_vm0 = vcmask 253952   ;;  %v513_v0 = vmov 0.0  }
  0x20   : > { %268 = vst.msk [vmem:[#allocation2] sm:$0x1] %vm267_vm0, %v513_v0 }
  0x21 PF: > { %s270_s15 = sld [smem:[#allocation6 + %s567_s0]]  ;;  %v271_v1 = vld [vmem:[%s261_s14] sm:$0x1]  ;;  %vm275_vm1 = vcmask 253952   ;;  %p400_p8 = scmp.ne.s32.totalorder %s567_s0, 55 }
  0x22   : > { %s317_s28 = sld [smem:[#allocation5]] (!%p400_p8) }
  0x27   : > { %v269_v2 = vld [vmem:[#allocation2] sm:$0x1]  ;;  %v272_v3 = vstv %s270_s15 }
  0x28   : > { %v273_v4 = vmul.f32 %v272_v3, %v271_v1  ;;  %280 = sbr.rel (%p400_p8) target bundleno = 329 (0x149), region = 56 }
  0x2a   : > { %v274_v5 = vadd.f32 %v273_v4, %v269_v2 }
  0x2c   : > { %276 = vst.msk [vmem:[#allocation2] sm:$0x1] %vm275_vm1, %v274_v5 }
  0x2d   : > { %v285_v6 = vld [vmem:[%s614_s3 + $0x18] sm:$0xff]  ;;  %v284_v7 = vld [vmem:[%s614_s3 + $0x10] sm:$0xff]  ;;  %v283_v8 = vld [vmem:[%s614_s3 + $0x8] sm:$0xff]  ;;  %vm287_vm2 = vcmask 261120   ;;  %v318_v18 = vstv %s317_s28  ;;  %vm334_vm4 = vcmask 0  }
  0x2e   : > { %303 = vmatpush.msra.mxu0 %v285_v6  ;;  %v282_v9 = vld [vmem:[%s614_s3] sm:$0xff] }
  0x2f   : > { %v286_v11 = vld [vmem:[%s615_s4] sm:$0x1] }
  0x30   : > { %304 = vmatpush.msra.mxu0 %v284_v7  ;;  %v312_v14 = vld [vmem:[%s616_s5] sm:$0x1] }
  0x32   : > { %305 = vmatpush.msra.mxu0 %v283_v8 }
  0x33   : > { %v281_v10 = vld [vmem:[#allocation2] sm:$0x1] }
  0x34   : > { %306 = vmatpush.msra.mxu0 %v282_v9 }
  0x35   : > { %401 = vmatmul.msk.f32.vlgmr.msra.gmra.mxu0 %vm287_vm2, %v281_v10 }
  0xb2   : > { %v308_v12 = vpop.f32.mrf.mxu0 }
  0xb3   : > { %v309_v13 = vadd.f32 %v308_v12, %v286_v11 }
  0xb5   : > { %v311_v15 = vmax.f32 %v309_v13, 0.0 }
  0xb7   : > { %v313_v16 = vmul.f32 %v312_v14, %v311_v15 }
  0xb9   : > { %v314_v17 = vsel %vm275_vm1, %v313_v16, 0.0 }
  0xba   : > { %315 = vadd.xlane.f32.xlu0 %v314_v17 }
 0x12d   : > { %v316_v19 = vpop.xlane.xlu0 %315 }
 0x12e   : > { %v319_v20 = vadd.f32 %v318_v18, %v316_v19 }
 0x130   : > { %v321_v21 = vmin.f32 %v319_v20, 20.0  ;;  %vm320_vm5 = vcmp.gt.f32.partialorder %v319_v20, 20.0 }
 0x132   : > { %v322_v22 = vmul.f32 1.442695, %v321_v21 }
 0x134   : > { %434 = vpow2.f32 %v322_v22 }
 0x13a   : > { %v435_v23 = vpop.eup %434 }
 0x13b   : > { %v324_v24 = vadd.f32 1.0, %v435_v23  ;;  %v327_v25 = vmul.f32 -0.5, %v435_v23  ;;  %v330_v27 = vand.u32 2147483647, %v435_v23 }
 0x13d   : > { %436 = vlog2.f32 %v324_v24  ;;  %v328_v26 = vadd.f32 1.0, %v327_v25  ;;  %vm331_vm3 = vcmp.lt.f32.partialorder %v330_v27, 0.0004427343 }
 0x13f   : > { %v329_v30 = vmul.f32 %v435_v23, %v328_v26 }
 0x143   : > { %v437_v28 = vpop.eup %436 }
 0x144   : > { %v326_v29 = vmul.f32 0.6931472, %v437_v28 }
 0x146   : > { %v332_v31 = vsel %vm331_vm3, %v329_v30, %v326_v29 }
 0x147   : > { %v333_v32 = vsel %vm320_vm5, %v319_v20, %v332_v31 }
 0x148   : > { %335 = vst.msk [vmem:[#allocation9] sm:$0x1] %vm334_vm4, %v333_v32 }
 0x149 PF: > { %p420_p9 = scmp.eq.s32.totalorder %s567_s0, 55  ;;  %s514_s29 = smov [#allocation9]  }
 0x14a   : > { %s342_s6 = sshll.u32 %s514_s29, 4  ;;  %s344_s10 = sshll.u32 %s618_s7, 4  ;;  %s343_s6 = int_to_ptr.vmem [resolvable:$true] %s342_s6  ;;  %s345_s10 = int_to_ptr.hbm [resolvable:$true] %s344_s10 }
 0x14b   : > { %411 = dma.vmem_to_hbm [thread:$0]  (%p420_p9), %s343_s6, 16, %s345_s10, [#allocation7]  }
 0x14c   : > { %504 = dma.done.wait (%p420_p9), [#allocation7], 16  }
 0x14d   : > { %506 = vsyncadd (%p420_p9), [#allocation7], 4294967280 }
 0x14e PF: > { %s28_s30 = sadd.s32 1, %s509_s30  }
 0x14f   : > { %p25_p10 = scmp.ge.s32.totalorder %s28_s30, 58  }
 0x151   :  { %27 = sbr.rel (!%p25_p10) target bundleno = 8 (0x8), region = 84 }
 0x156   :  { %358 = vsyncpa [#allocation7], 1 }
 0x157   :  { %360 = vsyncpa [#allocation7 + $0x1], 1 }
 0x158   :  { %361 = vsyncpa [#allocation8], 1 }
 0x159   :  { %363 = vsyncpa [#allocation8 + $0x1], 1 }

</bundles_post_ra>
